<compile_context>
chip_gen: v7x
topology: tpu7x:2x2x1
jax: 0.10.0
libtpu: 0.0.40
codegen_flags: <defaults>
</compile_context>

<pallas_src>
import functools

import jax
import jax.numpy as jnp
from jax.experimental import pallas as pl
from jax.experimental.pallas import tpu as pltpu


def _round_up(n, m):
    return ((n + m - 1) // m) * m


def mlp_kernel(x_ref,
               w1_ref, b1_ref,
               w2_ref, b2_ref,
               w3_ref, b3_ref,
               w4_ref, b4_ref,
               out_ref):
    # x arrives as f32 (no wrapper cast round-trip); weights are pre-cast
    # bf16.  Every dot accumulates in f32 on the MXU.
    cdt = w1_ref.dtype
    x = x_ref[...].astype(cdt)

    # hidden1 + ReLU
    h = jnp.dot(x, w1_ref[...], preferred_element_type=jnp.float32) + b1_ref[...]
    h = jnp.maximum(h, 0.0)

    # hidden2 + ReLU
    h = jnp.dot(h.astype(cdt), w2_ref[...],
                preferred_element_type=jnp.float32) + b2_ref[...]
    h = jnp.maximum(h, 0.0)

    # hidden3 + ReLU
    h = jnp.dot(h.astype(cdt), w3_ref[...],
                preferred_element_type=jnp.float32) + b3_ref[...]
    h = jnp.maximum(h, 0.0)

    # output (no activation); unpadded (tb, out_f) block -> 32x fewer
    # writeback bytes than a 128-lane-padded slab.
    y = jnp.dot(h.astype(cdt), w4_ref[...],
                preferred_element_type=jnp.float32) + b4_ref[...]
    out_ref[...] = y.astype(out_ref.dtype)


def prepare_params(params, compute_dtype=jnp.bfloat16):
    """One-time cast of weights to the MXU compute dtype.

    Doing this once (instead of per forward call) removes un-fused HBM
    read+write wrapper ops that would otherwise rival the kernel's own bytes.
    Biases stay f32 (they are added to the f32 accumulator).
    """
    prepped = dict(params)
    for k in ("w1", "w2", "w3", "w4"):
        prepped[k] = params[k].astype(compute_dtype)
    return prepped


def neural_net_forward(x, params, *, tb_max=2048):
    """x: (B, input_size) float32; params: prepare_params() output.

    Returns (B, output_size) float32.
    """
    w1, b1 = params["w1"], params["b1"]
    w2, b2 = params["w2"], params["b2"]
    w3, b3 = params["w3"], params["b3"]
    w4, b4 = params["w4"], params["b4"]

    B, in_f = x.shape
    h1 = w1.shape[1]
    h2 = w2.shape[1]
    h3 = w3.shape[1]
    out_f = w4.shape[1]

    # Batch tile: multiple of 16 rows (full bf16 sublane packing), as large
    # as possible (per-step overhead amortization), capped so the grid has
    # >= 2 steps for big batches (v7x megacore: both TensorCores busy).
    tb = min(tb_max, _round_up(B, 16))
    if B >= 32:
        tb = min(tb, _round_up((B + 1) // 2, 16))
    b_pad = _round_up(B, tb)

    xd = x
    if b_pad != B:
        # TODO(synk): for very large ragged B, mask the tail step with pl.when
        # instead of padding; padding is cheap at these sizes.
        xd = jnp.pad(xd, ((0, b_pad - B), (0, 0)))

    grid = (b_pad // tb,)
    resident = lambda i: (0, 0)   # weights/biases: same block every step

    flops = 2 * b_pad * (in_f * h1 + h1 * h2 + h2 * h3 + h3 * out_f)
    bytes_accessed = (
        b_pad * in_f * 4                                     # x (f32)
        + (in_f * h1 + h1 * h2 + h2 * h3 + h3 * out_f) * 2   # weights (bf16)
        + (h1 + h2 + h3 + out_f) * 4                         # biases (f32)
        + b_pad * out_f * 4                                  # output (f32)
    )

    out = pl.pallas_call(
        mlp_kernel,
        out_shape=jax.ShapeDtypeStruct((b_pad, out_f), jnp.float32),
        grid=grid,
        in_specs=[
            pl.BlockSpec((tb, in_f), lambda i: (i, 0)),      # x: batch-tiled
            pl.BlockSpec((in_f, h1), resident),
            pl.BlockSpec((1, h1), resident),
            pl.BlockSpec((h1, h2), resident),
            pl.BlockSpec((1, h2), resident),
            pl.BlockSpec((h2, h3), resident),
            pl.BlockSpec((1, h3), resident),
            pl.BlockSpec((h3, out_f), resident),
            pl.BlockSpec((1, out_f), resident),
        ],
        # Unpadded last dim (== full array dim) -> legal block, 32x fewer
        # output DMA bytes than padding to 128 lanes.
        out_specs=pl.BlockSpec((tb, out_f), lambda i: (i, 0)),
        compiler_params=pltpu.CompilerParams(
            dimension_semantics=("parallel",)),              # megacore on v7x
        cost_estimate=pl.CostEstimate(
            flops=flops, transcendentals=0, bytes_accessed=bytes_accessed),
    )(xd, w1, b1, w2, b2, w3, b3, w4, b4)

    return out[:B]


def init_params(key, input_size, hidden_size, output_size):
    """Deterministic init mirroring PyTorch nn.Linear default
    (U[-1/sqrt(fan_in), +1/sqrt(fan_in)])."""
    sizes = [
        (input_size, hidden_size),
        (hidden_size, hidden_size // 2),
        (hidden_size // 2, hidden_size // 4),
        (hidden_size // 4, output_size),
    ]
    params = {}
    for i, (fan_in, fan_out) in enumerate(sizes, start=1):
        key, kw, kb = jax.random.split(key, 3)
        bound = 1.0 / jnp.sqrt(jnp.float32(fan_in))
        params[f"w{i}"] = jax.random.uniform(
            kw, (fan_in, fan_out), jnp.float32, minval=-bound, maxval=bound)
        params[f"b{i}"] = jax.random.uniform(
            kb, (1, fan_out), jnp.float32, minval=-bound, maxval=bound)
    return params


def reference_forward_f32(x, params):
    h = jnp.maximum(x @ params["w1"] + params["b1"], 0.0)
    h = jnp.maximum(h @ params["w2"] + params["b2"], 0.0)
    h = jnp.maximum(h @ params["w3"] + params["b3"], 0.0)
    return h @ params["w4"] + params["b4"]


def reference_forward_matched(x, params, compute_dtype=jnp.bfloat16):
    """Pure-JAX reference with identical precision policy (bf16 operands,
    f32 accumulation) for a tight correctness check of the kernel."""
    dot = functools.partial(jnp.dot, preferred_element_type=jnp.float32)
    h = dot(x.astype(compute_dtype), params["w1"].astype(compute_dtype)) + params["b1"]
    h = jnp.maximum(h, 0.0)
    h = dot(h.astype(compute_dtype), params["w2"].astype(compute_dtype)) + params["b2"]
    h = jnp.maximum(h, 0.0)
    h = dot(h.astype(compute_dtype), params["w3"].astype(compute_dtype)) + params["b3"]
    h = jnp.maximum(h, 0.0)
    return dot(h.astype(compute_dtype), params["w4"].astype(compute_dtype)) + params["b4"]


if __name__ == "__main__":
    input_size, hidden_size, output_size = 32, 32, 4
    batch = 8

    key = jax.random.PRNGKey(0)
    key, kx = jax.random.split(key)
    x = jax.random.normal(kx, (batch, input_size), jnp.float32)
    params = init_params(key, input_size, hidden_size, output_size)

    # One-time weight cast (hoisted out of the per-call forward path).
    prepped = prepare_params(params)

    out = neural_net_forward(x, prepped)
    out = jax.block_until_ready(out)
    assert out.shape == (batch, output_size)

    # Tight check vs a precision-matched (bf16 operand / f32 accum) reference.
    ref_matched = reference_forward_matched(x, params)
    assert jnp.allclose(out, ref_matched, atol=1e-3, rtol=1e-3), \
        "mismatch vs precision-matched reference"

    # Loose sanity check vs the full-f32 reference (bf16 storage rounding).
    ref_f32 = reference_forward_f32(x, params)
    assert jnp.allclose(out, ref_f32, atol=1e-1), "mismatch vs f32 reference"

    print("KERNEL_OK")
</pallas_src>

<mosaic_0001>
module attributes {stable_mosaic.version = 11 : i64} {
  func.func @mlp_kernel(%arg0: i32, %arg1: memref<16x32xf32, #tpu.memory_space<vmem>>, %arg2: memref<32x32xbf16, #tpu.memory_space<vmem>>, %arg3: memref<1x32xf32, #tpu.memory_space<vmem>>, %arg4: memref<32x16xbf16, #tpu.memory_space<vmem>>, %arg5: memref<1x16xf32, #tpu.memory_space<vmem>>, %arg6: memref<16x8xbf16, #tpu.memory_space<vmem>>, %arg7: memref<1x8xf32, #tpu.memory_space<vmem>>, %arg8: memref<8x4xbf16, #tpu.memory_space<vmem>>, %arg9: memref<1x4xf32, #tpu.memory_space<vmem>>, %arg10: memref<16x4xf32, #tpu.memory_space<vmem>>) attributes {dimension_semantics = [#tpu.dimension_semantics<parallel>], iteration_bounds = array<i64: 1>, scalar_prefetch = 0 : i64, scratch_operands = 0 : i64, tpu.core_type = #tpu.core_type<tc>, window_params = [{transform_indices = @transform_0, window_bounds = array<i64: 16, 32>}, {pipeline_mode = #tpu.pipeline_mode<synchronous>, transform_indices = @transform_1, window_bounds = array<i64: 32, 32>}, {pipeline_mode = #tpu.pipeline_mode<synchronous>, transform_indices = @transform_2, window_bounds = array<i64: 1, 32>}, {pipeline_mode = #tpu.pipeline_mode<synchronous>, transform_indices = @transform_3, window_bounds = array<i64: 32, 16>}, {pipeline_mode = #tpu.pipeline_mode<synchronous>, transform_indices = @transform_4, window_bounds = array<i64: 1, 16>}, {pipeline_mode = #tpu.pipeline_mode<synchronous>, transform_indices = @transform_5, window_bounds = array<i64: 16, 8>}, {pipeline_mode = #tpu.pipeline_mode<synchronous>, transform_indices = @transform_6, window_bounds = array<i64: 1, 8>}, {pipeline_mode = #tpu.pipeline_mode<synchronous>, transform_indices = @transform_7, window_bounds = array<i64: 8, 4>}, {pipeline_mode = #tpu.pipeline_mode<synchronous>, transform_indices = @transform_8, window_bounds = array<i64: 1, 4>}, {transform_indices = @transform_9, window_bounds = array<i64: 16, 4>}]} {
    %c0 = arith.constant 0 : index
    %c0_0 = arith.constant 0 : index
    %0 = vector.load %arg1[%c0, %c0_0] : memref<16x32xf32, #tpu.memory_space<vmem>>, vector<16x32xf32>
    %1 = arith.truncf %0 : vector<16x32xf32> to vector<16x32xbf16>
    %c0_1 = arith.constant 0 : index
    %c0_2 = arith.constant 0 : index
    %2 = vector.load %arg2[%c0_1, %c0_2] : memref<32x32xbf16, #tpu.memory_space<vmem>>, vector<32x32xbf16>
    %cst = arith.constant dense<0.000000e+00> : vector<16x32xf32>
    %3 = tpu.matmul %1, %2, %cst {dimension_numbers = #tpu.dot_dimension_numbers<[1], [0], [0], [1], [0, 0, 1, 1], [], []>} : vector<16x32xbf16>, vector<32x32xbf16>, vector<16x32xf32> -> vector<16x32xf32>
    %c0_3 = arith.constant 0 : index
    %c0_4 = arith.constant 0 : index
    %4 = vector.load %arg3[%c0_3, %c0_4] : memref<1x32xf32, #tpu.memory_space<vmem>>, vector<1x32xf32>
    %5 = vector.broadcast %4 : vector<1x32xf32> to vector<16x32xf32>
    %6 = arith.addf %3, %5 : vector<16x32xf32>
    %cst_5 = arith.constant 0.000000e+00 : f32
    %7 = vector.broadcast %cst_5 : f32 to vector<16x32xf32>
    %8 = arith.maximumf %6, %7 : vector<16x32xf32>
    %9 = arith.truncf %8 : vector<16x32xf32> to vector<16x32xbf16>
    %c0_6 = arith.constant 0 : index
    %c0_7 = arith.constant 0 : index
    %10 = vector.load %arg4[%c0_6, %c0_7] : memref<32x16xbf16, #tpu.memory_space<vmem>>, vector<32x16xbf16>
    %cst_8 = arith.constant dense<0.000000e+00> : vector<16x16xf32>
    %11 = tpu.matmul %9, %10, %cst_8 {dimension_numbers = #tpu.dot_dimension_numbers<[1], [0], [0], [1], [0, 0, 1, 1], [], []>} : vector<16x32xbf16>, vector<32x16xbf16>, vector<16x16xf32> -> vector<16x16xf32>
    %c0_9 = arith.constant 0 : index
    %c0_10 = arith.constant 0 : index
    %12 = vector.load %arg5[%c0_9, %c0_10] : memref<1x16xf32, #tpu.memory_space<vmem>>, vector<1x16xf32>
    %13 = vector.broadcast %12 : vector<1x16xf32> to vector<16x16xf32>
    %14 = arith.addf %11, %13 : vector<16x16xf32>
    %cst_11 = arith.constant 0.000000e+00 : f32
    %15 = vector.broadcast %cst_11 : f32 to vector<16x16xf32>
    %16 = arith.maximumf %14, %15 : vector<16x16xf32>
    %17 = arith.truncf %16 : vector<16x16xf32> to vector<16x16xbf16>
    %c0_12 = arith.constant 0 : index
    %c0_13 = arith.constant 0 : index
    %18 = vector.load %arg6[%c0_12, %c0_13] : memref<16x8xbf16, #tpu.memory_space<vmem>>, vector<16x8xbf16>
    %cst_14 = arith.constant dense<0.000000e+00> : vector<16x8xf32>
    %19 = tpu.matmul %17, %18, %cst_14 {dimension_numbers = #tpu.dot_dimension_numbers<[1], [0], [0], [1], [0, 0, 1, 1], [], []>} : vector<16x16xbf16>, vector<16x8xbf16>, vector<16x8xf32> -> vector<16x8xf32>
    %c0_15 = arith.constant 0 : index
    %c0_16 = arith.constant 0 : index
    %20 = vector.load %arg7[%c0_15, %c0_16] : memref<1x8xf32, #tpu.memory_space<vmem>>, vector<1x8xf32>
    %21 = vector.broadcast %20 : vector<1x8xf32> to vector<16x8xf32>
    %22 = arith.addf %19, %21 : vector<16x8xf32>
    %cst_17 = arith.constant 0.000000e+00 : f32
    %23 = vector.broadcast %cst_17 : f32 to vector<16x8xf32>
    %24 = arith.maximumf %22, %23 : vector<16x8xf32>
    %25 = arith.truncf %24 : vector<16x8xf32> to vector<16x8xbf16>
    %c0_18 = arith.constant 0 : index
    %c0_19 = arith.constant 0 : index
    %26 = vector.load %arg8[%c0_18, %c0_19] : memref<8x4xbf16, #tpu.memory_space<vmem>>, vector<8x4xbf16>
    %cst_20 = arith.constant dense<0.000000e+00> : vector<16x4xf32>
    %27 = tpu.matmul %25, %26, %cst_20 {dimension_numbers = #tpu.dot_dimension_numbers<[1], [0], [0], [1], [0, 0, 1, 1], [], []>} : vector<16x8xbf16>, vector<8x4xbf16>, vector<16x4xf32> -> vector<16x4xf32>
    %c0_21 = arith.constant 0 : index
    %c0_22 = arith.constant 0 : index
    %28 = vector.load %arg9[%c0_21, %c0_22] : memref<1x4xf32, #tpu.memory_space<vmem>>, vector<1x4xf32>
    %29 = vector.broadcast %28 : vector<1x4xf32> to vector<16x4xf32>
    %30 = arith.addf %27, %29 : vector<16x4xf32>
    %c0_23 = arith.constant 0 : index
    %c0_24 = arith.constant 0 : index
    %31 = vector.load %arg10[%c0_23, %c0_24] : memref<16x4xf32, #tpu.memory_space<vmem>>, vector<16x4xf32>
    tpu.vector_store %arg10[%c0_23, %c0_24], %30 {strides = array<i32>} : memref<16x4xf32, #tpu.memory_space<vmem>>, vector<16x4xf32>,
    return
  }
  func.func @transform_0(%arg0: i32) -> (i32, i32) {
    %c0_i32 = arith.constant 0 : i32
    %c0_i32_0 = arith.constant 0 : i32
    return %arg0, %c0_i32 : i32, i32
  }
  func.func @transform_1(%arg0: i32) -> (i32, i32) {
    %c0_i32 = arith.constant 0 : i32
    %c0_i32_0 = arith.constant 0 : i32
    %c0_i32_1 = arith.constant 0 : i32
    return %c0_i32, %c0_i32_0 : i32, i32
  }
  func.func @transform_2(%arg0: i32) -> (i32, i32) {
    %c0_i32 = arith.constant 0 : i32
    %c0_i32_0 = arith.constant 0 : i32
    %c0_i32_1 = arith.constant 0 : i32
    return %c0_i32, %c0_i32_0 : i32, i32
  }
  func.func @transform_3(%arg0: i32) -> (i32, i32) {
    %c0_i32 = arith.constant 0 : i32
    %c0_i32_0 = arith.constant 0 : i32
    %c0_i32_1 = arith.constant 0 : i32
    return %c0_i32, %c0_i32_0 : i32, i32
  }
  func.func @transform_4(%arg0: i32) -> (i32, i32) {
    %c0_i32 = arith.constant 0 : i32
    %c0_i32_0 = arith.constant 0 : i32
    %c0_i32_1 = arith.constant 0 : i32
    return %c0_i32, %c0_i32_0 : i32, i32
  }
  func.func @transform_5(%arg0: i32) -> (i32, i32) {
    %c0_i32 = arith.constant 0 : i32
    %c0_i32_0 = arith.constant 0 : i32
    %c0_i32_1 = arith.constant 0 : i32
    return %c0_i32, %c0_i32_0 : i32, i32
  }
  func.func @transform_6(%arg0: i32) -> (i32, i32) {
    %c0_i32 = arith.constant 0 : i32
    %c0_i32_0 = arith.constant 0 : i32
    %c0_i32_1 = arith.constant 0 : i32
    return %c0_i32, %c0_i32_0 : i32, i32
  }
  func.func @transform_7(%arg0: i32) -> (i32, i32) {
    %c0_i32 = arith.constant 0 : i32
    %c0_i32_0 = arith.constant 0 : i32
    %c0_i32_1 = arith.constant 0 : i32
    return %c0_i32, %c0_i32_0 : i32, i32
  }
  func.func @transform_8(%arg0: i32) -> (i32, i32) {
    %c0_i32 = arith.constant 0 : i32
    %c0_i32_0 = arith.constant 0 : i32
    %c0_i32_1 = arith.constant 0 : i32
    return %c0_i32, %c0_i32_0 : i32, i32
  }
  func.func @transform_9(%arg0: i32) -> (i32, i32) {
    %c0_i32 = arith.constant 0 : i32
    %c0_i32_0 = arith.constant 0 : i32
    return %arg0, %c0_i32 : i32, i32
  }
}

</mosaic_0001>

<bundles_post_ra>
// kernel: tpu_custom_call.1
= control target key start
LH: loop header
LB: loop body
LE: loop exit
PB: predicated region body
PF: predicated region fallthrough
CT: control target
= control target key end

     0   :  { %v362_v0 = vmov 0.0   ;;  %vm363_vm0 = vmmov 0   ;;  %vm59_vm1 = vcmask 261120   ;;  %vm192_vm2 = vcmask 130048   ;;  %s462_s1 = inlined_call_operand.vmem [shape: bf16[32,32], index: 1, kind: input, shape index: {}]   ;;  %s463_s0 = inlined_call_operand.vmem [shape: f32[16,32], index: 0, kind: input, shape index: {}]   ;;  %s464_s3 = inlined_call_operand.vmem [shape: bf16[32,16], index: 3, kind: input, shape index: {}]   ;;  %s465_s2 = inlined_call_operand.vmem [shape: f32[1,32], index: 2, kind: input, shape index: {}]   ;;  %s466_s5 = inlined_call_operand.vmem [shape: bf16[16,8], index: 5, kind: input, shape index: {}]   ;;  %s467_s4 = inlined_call_operand.vmem [shape: f32[1,16], index: 4, kind: input, shape index: {}]   ;;  %s468_s7 = inlined_call_operand.vmem [shape: bf16[8,4], index: 7, kind: input, shape index: {}]   ;;  %s469_s6 = inlined_call_operand.vmem [shape: f32[1,8], index: 6, kind: input, shape index: {}]   ;;  %s470_s8 = inlined_call_operand.vmem [shape: f32[1,4], index: 8, kind: input, shape index: {}]   ;;  %s471_s9 = inlined_call_operand.vmem [shape: f32[16,4], index: 9, kind: output, shape index: {}]  }
   0x1   :  { %327 = vmatprep.subr.bf16.mxu0 %v362_v0  ;;  %v357_v1 = vld [vmem:[%s462_s1] sm:$0xff]   ;;  %331 = vmatprep.mubr.msk.bf16.mxu0 %vm363_vm0, %v362_v0  ;;  %v358_v2 = vld [vmem:[%s462_s1 + $0x8] sm:$0xff]   ;;  %vm252_vm3 = vcmask 1043456   ;;  %vm248_vm4 = vcmask 64512   ;;  %vm297_vm5 = vcmask 31744  }
   0x2   :  { %335 = vmatprep.subr.bf16.mxu1 %v362_v0  ;;  %339 = vmatprep.mubr.msk.bf16.mxu1 %vm363_vm0, %v362_v0  ;;  %v33_v3 = vld [vmem:[%s463_s0] sm:$0xff]  ;;  %v34_v4 = vld [vmem:[%s463_s0 + $0x8] sm:$0xff] }
   0x3   :  { %328 = vmatpush3.bf16.msra.mxu0 %v357_v1  ;;  %v35_v5 = vpack.c.bf16 %v34_v4, %v33_v3  ;;  %v359_v6 = vld [vmem:[%s464_s3] sm:$0xff]   ;;  %v360_v7 = vld [vmem:[%s464_s3 + $0x8] sm:$0xff]  }
   0x4   :  { %329 = vmatprep.subr.bf16.mxu0 %v362_v0  ;;  %336 = vmatpush3.bf16.msra.mxu1 %v359_v6  ;;  %v304_v8 = vld [vmem:[%s465_s2] ss:$0 sm:$0xff] }
   0x5   :  { %337 = vmatprep.subr.bf16.mxu1 %v362_v0  ;;  %v361_v18 = vld [vmem:[%s466_s5] sm:$0xff]  }
   0x6   :  { %v308_v19 = vld [vmem:[%s467_s4] ss:$0 sm:$0xff] }
   0x7   :  { %330 = vmatpush3.bf16.msra.mxu0 %v358_v2  ;;  %v240_v29 = vld [vmem:[%s468_s7] sm:$0xf] }
   0x8   :  { %343 = vmatprep.subr.bf16.mxu0 %v362_v0  ;;  %338 = vmatpush3.bf16.msra.mxu1 %v360_v7  ;;  %v254_v30 = vsel %vm252_vm3, %v240_v29, 0  ;;  %v312_v31 = vld [vmem:[%s469_s6] ss:$0 sm:$0xff] }
   0x9   :  { %349 = vmatprep.subr.bf16.mxu1 %v362_v0  ;;  %v315_v41 = vld [vmem:[%s470_s8] ss:$0 sm:$0xff] }
   0xa   :  { %332 = vmatmul.mubr.msk.bf16.vlgmr.msra.gmra.mrb[0].mxu0 %vm59_vm1, %v35_v5 }
   0xb   :  { %345 = vmatprep.mubr.msk.bf16.mxu0 %vm363_vm0, %v362_v0  ;;  %344 = vmatpush3.bf16.msra.mxu0 %v361_v18 }
  0xdd   :  { %v97_v9 = vpop.f32.mrb[0].mxu0 }
  0xde   :  { %v98_v10 = vadd.f32 %v304_v8, %v97_v9  ;;  %v333_v11 = vpop.f32.mrb[1].mxu0 }
  0xdf   :  { %v100_v12 = vpop.f32.mrb[2].mxu0 }
  0xe0   :  { %v101_v13 = vadd.f32 %v304_v8, %v100_v12  ;;  %v334_v14 = vpop.f32.mrb[3].mxu0  ;;  %v104_v15 = vmax.f32 %v98_v10, 0.0 }
  0xe2   :  { %v105_v16 = vmax.f32 %v101_v13, 0.0 }
  0xe4   :  { %v106_v17 = vpack.c.bf16 %v105_v16, %v104_v15 }
  0xe6   :  { %340 = vmatmul.mubr.msk.bf16.vlgmr.msra.gmra.mrb[0].mxu1 %vm59_vm1, %v106_v17 }
  0xe7   :  { %351 = vmatprep.mubr.msk.bf16.mxu1 %vm363_vm0, %v362_v0  ;;  %350 = vmatpush3.bf16.msra.mxu1 %v254_v30 }
 0x1b9   :  { %v167_v20 = vpop.f32.mrb[0].mxu1 }
 0x1ba   :  { %v168_v21 = vadd.f32 %v308_v19, %v167_v20  ;;  %v341_v22 = vpop.f32.mrb[1].mxu1 }
 0x1bb   :  { %v170_v23 = vpop.f32.mrb[2].mxu1 }
 0x1bc   :  { %v171_v24 = vadd.f32 %v308_v19, %v170_v23  ;;  %v342_v25 = vpop.f32.mrb[3].mxu1  ;;  %v174_v26 = vmax.f32 %v168_v21, 0.0 }
 0x1be   :  { %v175_v27 = vmax.f32 %v171_v24, 0.0 }
 0x1c0   :  { %v176_v28 = vpack.c.bf16 %v175_v27, %v174_v26 }
 0x1c2   :  { %346 = vmatmul.mubr.msk.bf16.vlgmr.msra.gmra.mrb[4].mxu0 %vm192_vm2, %v176_v28 }
 0x295   :  { %v230_v32 = vpop.f32.mrb[4].mxu0 }
 0x296   :  { %v231_v33 = vadd.f32 %v312_v31, %v230_v32  ;;  %v347_v34 = vpop.f32.mrb[5].mxu0 }
 0x297   :  { %v233_v35 = vpop.f32.mrb[6].mxu0 }
 0x298   :  { %v234_v36 = vadd.f32 %v312_v31, %v233_v35  ;;  %v348_v37 = vpop.f32.mrb[7].mxu0  ;;  %v237_v38 = vmax.f32 %v231_v33, 0.0 }
 0x29a   :  { %v238_v39 = vmax.f32 %v234_v36, 0.0 }
 0x29c   :  { %v239_v40 = vpack.c.bf16 %v238_v39, %v237_v38 }
 0x29e   :  { %352 = vmatmul.mubr.msk.bf16.vlgmr.msra.gmra.mrb[4].mxu1 %vm248_vm4, %v239_v40 }
 0x371   :  { %v290_v42 = vpop.f32.mrb[4].mxu1 }
 0x372   :  { %v291_v43 = vadd.f32 %v315_v41, %v290_v42  ;;  %v353_v44 = vpop.f32.mrb[5].mxu1 }
 0x373   :  { %v293_v45 = vpop.f32.mrb[6].mxu1 }
 0x374   :  { %298 = vst.msk [vmem:[%s471_s9] sm:$0xff] %vm297_vm5, %v291_v43  ;;  %v294_v46 = vadd.f32 %v315_v41, %v293_v45  ;;  %v354_v47 = vpop.f32.mrb[7].mxu1 }
 0x376   :  { %299 = vst.msk [vmem:[%s471_s9 + $0x8] sm:$0xff] %vm297_vm5, %v294_v46 }

</bundles_post_ra>
